<compile_context>
chip_gen: v7x
topology: tpu7x:2x2x1
jax: 0.10.0
libtpu: 0.0.40
codegen_flags: <defaults>
</compile_context>

<pallas_src>
import functools

import jax
import jax.numpy as jnp
from jax.experimental import pallas as pl
from jax.experimental.pallas import tpu as pltpu


def _round_up(x, m):
    return (x + m - 1) // m * m


def _cdiv(a, b):
    return -(-a // b)


# --------------------------------------------------------------------------
# Fused kernel: num_layers decoder layers + optional LayerNorm on a row tile.
# Every layer only contracts the feature axis (row-wise), so a row tile runs
# the whole depth with no cross-tile communication.
# --------------------------------------------------------------------------
def _fused_decoder_kernel(*refs, num_layers, apply_norm, eps, d_real,
                          mem_projected):
    f32 = jnp.float32
    bf16 = jnp.bfloat16

    if mem_projected:
        (tgt_ref, memp_ref, w1_ref, w2_ref, b2_ref,
         gamma_ref, beta_ref, out_ref) = refs
    else:
        (tgt_ref, mem_ref, w1_ref, wm_ref, b1_ref, w2_ref, b2_ref,
         gamma_ref, beta_ref, out_ref) = refs

    # Residual / accumulator path stays f32; MXU operands are bf16.
    x = tgt_ref[...].astype(f32)
    w1 = w1_ref[...]                      # bf16, resident in VMEM
    w2 = w2_ref[...]                      # bf16, resident in VMEM

    # Loop-invariant memory projection + first bias (identical for every
    # deep-cloned layer), hoisted out of the depth loop.
    if mem_projected:
        mem_proj = memp_ref[...].astype(f32)
    else:
        mem_proj = jnp.dot(mem_ref[...].astype(bf16), wm_ref[...],
                           preferred_element_type=f32) + b1_ref[...].astype(f32)

    # Hoist the loop-invariant b2 broadcast (JAX does not CSE broadcasts).
    b2b = jnp.broadcast_to(b2_ref[...].astype(f32), x.shape)

    def layer(_, x):
        h = jnp.maximum(
            jnp.dot(x.astype(bf16), w1, preferred_element_type=f32) + mem_proj,
            0.0)
        return jnp.dot(h.astype(bf16), w2, preferred_element_type=f32) + b2b + x

    x = jax.lax.fori_loop(0, num_layers, layer, x, unroll=True)

    if apply_norm:
        # Padded feature lanes of x contribute only via the mask below; sums
        # are divided by the *real* feature width.
        inv_d = 1.0 / float(d_real)
        mean = jnp.sum(x, axis=-1, keepdims=True) * inv_d
        lane = jax.lax.broadcasted_iota(jnp.int32, x.shape, 1)
        diff = jnp.where(lane < d_real, x - mean, 0.0)
        var = jnp.sum(diff * diff, axis=-1, keepdims=True) * inv_d
        inv = jax.lax.rsqrt(var + eps)
        # gamma/beta are zero-padded -> padded output lanes stay zero.
        x = diff * inv * gamma_ref[...].astype(f32) + beta_ref[...].astype(f32)

    out_ref[...] = x.astype(out_ref.dtype)


# --------------------------------------------------------------------------
# Wrapper: padding, per-chip VMEM budgeting, tiling, pallas_call.
# --------------------------------------------------------------------------
def mlp_decoder_forward(tgt, memory, layer_params, norm_params, num_layers,
                        tgt_mask=None, memory_mask=None, *, eps=1e-5):
    """Mirror of MLP_decoder.forward: fused layer stack + optional norm."""
    del tgt_mask, memory_mask  # no effect in an MLP (non-attention) layer
    w1, wm, b1, w2, b2 = layer_params
    s, b, d = tgt.shape
    h = w1.shape[1]
    n = s * b
    dtype = tgt.dtype
    itemsize = jnp.dtype(dtype).itemsize
    bf16 = jnp.bfloat16

    # Lane-dense padding: features/hidden padded to multiples of 128.
    d_pad = _round_up(d, 128)
    h_pad = _round_up(h, 128)

    # ---- per-chip VMEM budget -------------------------------------------
    try:
        phys_vmem = int(pltpu.get_tpu_info().vmem_capacity_bytes)
    except Exception:
        phys_vmem = 64 << 20
    budget = phys_vmem * 3 // 4          # ~96 MiB on v5e/v6e, ~48 MiB on v7x

    # Resident weight footprint: bf16 weights, single-buffered (Buffered(1)).
    wm_bytes = d_pad * h_pad * 2
    weight_bytes = 2 * d_pad * h_pad * 2 + wm_bytes + (h_pad + 3 * d_pad) * 4

    # Residency guard (v7x 64 MiB): if holding Wm resident would blow the
    # budget, precompute mem_proj = memory @ Wm + b1 with a plain XLA matmul
    # (bf16 operands, f32 accumulation) and feed (n, h_pad) rows instead.
    mem_projected = weight_bytes > budget // 2
    if mem_projected:
        weight_bytes -= wm_bytes

    # ---- row tiling -------------------------------------------------------
    mem_cols = h_pad if mem_projected else d_pad
    # tgt + memory (or mem_proj) + out row tiles, each double-buffered.
    per_row = (2 * d_pad + mem_cols) * itemsize * 2
    avail = max(budget - weight_bytes - (4 << 20), 4 << 20)
    tile_cap = max(8, min(2048, int(avail // per_row)))
    if tile_cap >= 256:
        tile_cap = tile_cap // 256 * 256
    else:
        tile_cap = max(8, tile_cap // 8 * 8)

    # Balanced tiles, >= 2 grid steps so both v7x TensorCores get work.
    n8 = _round_up(max(n, 1), 8)
    num_tiles = max(2, _cdiv(n8, tile_cap))
    tile_n = _round_up(_cdiv(n8, num_tiles), 8)
    # Prefer 256-row multiples (fills the 256-wide MXU M dim) only when the
    # extra padded rows stay under ~10%.
    t256 = _round_up(tile_n, 256)
    if tile_n >= 256 and t256 * num_tiles * 10 <= n8 * 11:
        tile_n = t256
    n_pad = tile_n * num_tiles

    # ---- padding / dtype staging -----------------------------------------
    def pad2(x, rows, cols, dt=None):
        x = jnp.pad(x, ((0, rows - x.shape[0]), (0, cols - x.shape[1])))
        return x if dt is None else x.astype(dt)

    tgt2d = pad2(tgt.reshape(n, d), n_pad, d_pad)
    w1p = pad2(w1, d_pad, h_pad, bf16)
    w2p = pad2(w2, h_pad, d_pad, bf16)
    b2p = pad2(b2.reshape(1, d), 1, d_pad)

    if mem_projected:
        memp = jnp.dot(memory.reshape(n, d).astype(bf16), wm.astype(bf16),
                       preferred_element_type=jnp.float32) + b1.reshape(1, h)
        mem_in = pad2(memp.astype(dtype), n_pad, h_pad)
    else:
        mem_in = pad2(memory.reshape(n, d), n_pad, d_pad)
        wmp = pad2(wm, d_pad, h_pad, bf16)
        b1p = pad2(b1.reshape(1, h), 1, h_pad)

    apply_norm = norm_params is not None
    if apply_norm:
        gamma, beta = norm_params
        gp = pad2(gamma.reshape(1, d), 1, d_pad)
        bp = pad2(beta.reshape(1, d), 1, d_pad)
    else:
        gp = jnp.zeros((1, d_pad), dtype)
        bp = jnp.zeros((1, d_pad), dtype)

    # ---- specs / pallas_call ----------------------------------------------
    def row_spec(cols):
        return pl.BlockSpec((tile_n, cols), lambda i: (i, 0))

    def const_spec(shape):
        # Constant index_map -> single-buffer the resident block.
        return pl.BlockSpec(shape, lambda i: (0, 0),
                            pipeline_mode=pl.Buffered(1))

    in_specs = [row_spec(d_pad), row_spec(mem_cols)]
    args = [tgt2d, mem_in]
    if mem_projected:
        in_specs += [const_spec((d_pad, h_pad)), const_spec((h_pad, d_pad)),
                     const_spec((1, d_pad)), const_spec((1, d_pad)),
                     const_spec((1, d_pad))]
        args += [w1p, w2p, b2p, gp, bp]
    else:
        in_specs += [const_spec((d_pad, h_pad)), const_spec((d_pad, h_pad)),
                     const_spec((1, h_pad)), const_spec((h_pad, d_pad)),
                     const_spec((1, d_pad)), const_spec((1, d_pad)),
                     const_spec((1, d_pad))]
        args += [w1p, wmp, b1p, w2p, b2p, gp, bp]

    flops = 2 * n_pad * d_pad * h_pad * 2 * num_layers
    if not mem_projected:
        flops += 2 * n_pad * d_pad * h_pad
    bytes_accessed = ((tgt2d.size + mem_in.size + n_pad * d_pad) * itemsize
                      + weight_bytes)
    cost = pl.CostEstimate(flops=flops, transcendentals=n_pad,
                           bytes_accessed=bytes_accessed)

    out2d = pl.pallas_call(
        functools.partial(_fused_decoder_kernel,
                          num_layers=num_layers,
                          apply_norm=apply_norm,
                          eps=eps,
                          d_real=d,
                          mem_projected=mem_projected),
        out_shape=jax.ShapeDtypeStruct((n_pad, d_pad), dtype),
        grid=(num_tiles,),
        in_specs=in_specs,
        out_specs=row_spec(d_pad),
        compiler_params=pltpu.CompilerParams(
            dimension_semantics=("parallel",),   # shard row tiles across TCs
            vmem_limit_bytes=int(budget)),
        cost_estimate=cost,
    )(*args)

    return out2d[:n, :d].reshape(s, b, d)


# --------------------------------------------------------------------------
# Deterministic parameter init + demo
# --------------------------------------------------------------------------
if __name__ == "__main__":
    S, B, D, H = 8, 2, 32, 32
    NUM_LAYERS = 3

    key = jax.random.PRNGKey(0)
    ks = jax.random.split(key, 9)

    tgt = jax.random.normal(ks[0], (S, B, D), dtype=jnp.float32)
    memory = jax.random.normal(ks[1], (S, B, D), dtype=jnp.float32)

    scale = 0.1
    w1 = scale * jax.random.normal(ks[2], (D, H), dtype=jnp.float32)
    wm = scale * jax.random.normal(ks[3], (D, H), dtype=jnp.float32)
    b1 = scale * jax.random.normal(ks[4], (1, H), dtype=jnp.float32)
    w2 = scale * jax.random.normal(ks[5], (H, D), dtype=jnp.float32)
    b2 = scale * jax.random.normal(ks[6], (1, D), dtype=jnp.float32)
    gamma = jnp.ones((1, D), dtype=jnp.float32)
    beta = jnp.zeros((1, D), dtype=jnp.float32)

    layer_params = (w1, wm, b1, w2, b2)
    norm_params = (gamma, beta)

    out = mlp_decoder_forward(tgt, memory, layer_params, norm_params,
                              NUM_LAYERS)
    out = jax.block_until_ready(out)

    # Pure-JAX references: one mimicking the kernel's bf16-operand / f32-accum
    # MXU policy (tight tolerance), one in full f32 (loose tolerance).
    def ref_forward(tgt, memory, cast_bf16):
        n = S * B
        c = (lambda a: a.astype(jnp.bfloat16)) if cast_bf16 else (lambda a: a)
        x = tgt.reshape(n, D).astype(jnp.float32)
        m = memory.reshape(n, D).astype(jnp.float32)
        mem_proj = jnp.dot(c(m), c(wm),
                           preferred_element_type=jnp.float32) + b1
        for _ in range(NUM_LAYERS):
            hh = jnp.maximum(
                jnp.dot(c(x), c(w1),
                        preferred_element_type=jnp.float32) + mem_proj, 0.0)
            x = jnp.dot(c(hh), c(w2),
                        preferred_element_type=jnp.float32) + b2 + x
        mu = jnp.mean(x, axis=-1, keepdims=True)
        var = jnp.mean((x - mu) ** 2, axis=-1, keepdims=True)
        x = (x - mu) * jax.lax.rsqrt(var + 1e-5) * gamma + beta
        return x.reshape(S, B, D)

    ref_bf16 = ref_forward(tgt, memory, cast_bf16=True)
    ref_f32 = ref_forward(tgt, memory, cast_bf16=False)

    assert out.shape == (S, B, D)
    assert jnp.allclose(out, ref_bf16, atol=2e-3, rtol=2e-3), \
        float(jnp.max(jnp.abs(out - ref_bf16)))
    assert jnp.allclose(out, ref_f32, atol=5e-2, rtol=5e-2), \
        float(jnp.max(jnp.abs(out - ref_f32)))

    print("KERNEL_OK")
</pallas_src>

<mosaic_0001>
module attributes {stable_mosaic.version = 11 : i64} {
  func.func @_fused_decoder_kernel(%arg0: i32, %arg1: memref<8x128xf32, #tpu.memory_space<vmem>>, %arg2: memref<8x128xf32, #tpu.memory_space<vmem>>, %arg3: memref<128x128xbf16, #tpu.memory_space<vmem>>, %arg4: memref<128x128xbf16, #tpu.memory_space<vmem>>, %arg5: memref<1x128xf32, #tpu.memory_space<vmem>>, %arg6: memref<128x128xbf16, #tpu.memory_space<vmem>>, %arg7: memref<1x128xf32, #tpu.memory_space<vmem>>, %arg8: memref<1x128xf32, #tpu.memory_space<vmem>>, %arg9: memref<1x128xf32, #tpu.memory_space<vmem>>, %arg10: memref<8x128xf32, #tpu.memory_space<vmem>>) attributes {dimension_semantics = [#tpu.dimension_semantics<parallel>], iteration_bounds = array<i64: 2>, scalar_prefetch = 0 : i64, scratch_operands = 0 : i64, tpu.core_type = #tpu.core_type<tc>, window_params = [{transform_indices = @transform_0, window_bounds = array<i64: 8, 128>}, {transform_indices = @transform_1, window_bounds = array<i64: 8, 128>}, {pipeline_mode = #tpu.pipeline_mode<synchronous>, transform_indices = @transform_2, window_bounds = array<i64: 128, 128>}, {pipeline_mode = #tpu.pipeline_mode<synchronous>, transform_indices = @transform_3, window_bounds = array<i64: 128, 128>}, {pipeline_mode = #tpu.pipeline_mode<synchronous>, transform_indices = @transform_4, window_bounds = array<i64: 1, 128>}, {pipeline_mode = #tpu.pipeline_mode<synchronous>, transform_indices = @transform_5, window_bounds = array<i64: 128, 128>}, {pipeline_mode = #tpu.pipeline_mode<synchronous>, transform_indices = @transform_6, window_bounds = array<i64: 1, 128>}, {pipeline_mode = #tpu.pipeline_mode<synchronous>, transform_indices = @transform_7, window_bounds = array<i64: 1, 128>}, {pipeline_mode = #tpu.pipeline_mode<synchronous>, transform_indices = @transform_8, window_bounds = array<i64: 1, 128>}, {transform_indices = @transform_9, window_bounds = array<i64: 8, 128>}]} {
    %c0 = arith.constant 0 : index
    %c0_0 = arith.constant 0 : index
    %0 = vector.load %arg1[%c0, %c0_0] : memref<8x128xf32, #tpu.memory_space<vmem>>, vector<8x128xf32>
    %c0_1 = arith.constant 0 : index
    %c0_2 = arith.constant 0 : index
    %1 = vector.load %arg3[%c0_1, %c0_2] : memref<128x128xbf16, #tpu.memory_space<vmem>>, vector<128x128xbf16>
    %c0_3 = arith.constant 0 : index
    %c0_4 = arith.constant 0 : index
    %2 = vector.load %arg6[%c0_3, %c0_4] : memref<128x128xbf16, #tpu.memory_space<vmem>>, vector<128x128xbf16>
    %c0_5 = arith.constant 0 : index
    %c0_6 = arith.constant 0 : index
    %3 = vector.load %arg2[%c0_5, %c0_6] : memref<8x128xf32, #tpu.memory_space<vmem>>, vector<8x128xf32>
    %4 = arith.truncf %3 : vector<8x128xf32> to vector<8x128xbf16>
    %c0_7 = arith.constant 0 : index
    %c0_8 = arith.constant 0 : index
    %5 = vector.load %arg4[%c0_7, %c0_8] : memref<128x128xbf16, #tpu.memory_space<vmem>>, vector<128x128xbf16>
    %cst = arith.constant dense<0.000000e+00> : vector<8x128xf32>
    %6 = tpu.matmul %4, %5, %cst {dimension_numbers = #tpu.dot_dimension_numbers<[1], [0], [0], [1], [0, 0, 1, 1], [], []>} : vector<8x128xbf16>, vector<128x128xbf16>, vector<8x128xf32> -> vector<8x128xf32>
    %c0_9 = arith.constant 0 : index
    %c0_10 = arith.constant 0 : index
    %7 = vector.load %arg5[%c0_9, %c0_10] : memref<1x128xf32, #tpu.memory_space<vmem>>, vector<1x128xf32>
    %8 = vector.broadcast %7 : vector<1x128xf32> to vector<8x128xf32>
    %9 = arith.addf %6, %8 : vector<8x128xf32>
    %c0_11 = arith.constant 0 : index
    %c0_12 = arith.constant 0 : index
    %10 = vector.load %arg7[%c0_11, %c0_12] : memref<1x128xf32, #tpu.memory_space<vmem>>, vector<1x128xf32>
    %11 = vector.shape_cast %10 : vector<1x128xf32> to vector<1x128xf32>
    %12 = vector.broadcast %11 : vector<1x128xf32> to vector<8x128xf32>
    %c0_i32 = arith.constant 0 : i32
    %13 = arith.truncf %0 : vector<8x128xf32> to vector<8x128xbf16>
    %cst_13 = arith.constant dense<0.000000e+00> : vector<8x128xf32>
    %14 = tpu.matmul %13, %1, %cst_13 {dimension_numbers = #tpu.dot_dimension_numbers<[1], [0], [0], [1], [0, 0, 1, 1], [], []>} : vector<8x128xbf16>, vector<128x128xbf16>, vector<8x128xf32> -> vector<8x128xf32>
    %15 = arith.addf %14, %9 : vector<8x128xf32>
    %cst_14 = arith.constant 0.000000e+00 : f32
    %16 = vector.broadcast %cst_14 : f32 to vector<8x128xf32>
    %17 = arith.maximumf %15, %16 : vector<8x128xf32>
    %18 = arith.truncf %17 : vector<8x128xf32> to vector<8x128xbf16>
    %cst_15 = arith.constant dense<0.000000e+00> : vector<8x128xf32>
    %19 = tpu.matmul %18, %2, %cst_15 {dimension_numbers = #tpu.dot_dimension_numbers<[1], [0], [0], [1], [0, 0, 1, 1], [], []>} : vector<8x128xbf16>, vector<128x128xbf16>, vector<8x128xf32> -> vector<8x128xf32>
    %20 = arith.addf %19, %12 : vector<8x128xf32>
    %21 = arith.addf %20, %0 : vector<8x128xf32>
    %c1_i32 = arith.constant 1 : i32
    %22 = arith.truncf %21 : vector<8x128xf32> to vector<8x128xbf16>
    %cst_16 = arith.constant dense<0.000000e+00> : vector<8x128xf32>
    %23 = tpu.matmul %22, %1, %cst_16 {dimension_numbers = #tpu.dot_dimension_numbers<[1], [0], [0], [1], [0, 0, 1, 1], [], []>} : vector<8x128xbf16>, vector<128x128xbf16>, vector<8x128xf32> -> vector<8x128xf32>
    %24 = arith.addf %23, %9 : vector<8x128xf32>
    %cst_17 = arith.constant 0.000000e+00 : f32
    %25 = vector.broadcast %cst_17 : f32 to vector<8x128xf32>
    %26 = arith.maximumf %24, %25 : vector<8x128xf32>
    %27 = arith.truncf %26 : vector<8x128xf32> to vector<8x128xbf16>
    %cst_18 = arith.constant dense<0.000000e+00> : vector<8x128xf32>
    %28 = tpu.matmul %27, %2, %cst_18 {dimension_numbers = #tpu.dot_dimension_numbers<[1], [0], [0], [1], [0, 0, 1, 1], [], []>} : vector<8x128xbf16>, vector<128x128xbf16>, vector<8x128xf32> -> vector<8x128xf32>
    %29 = arith.addf %28, %12 : vector<8x128xf32>
    %30 = arith.addf %29, %21 : vector<8x128xf32>
    %c2_i32 = arith.constant 2 : i32
    %31 = arith.truncf %30 : vector<8x128xf32> to vector<8x128xbf16>
    %cst_19 = arith.constant dense<0.000000e+00> : vector<8x128xf32>
    %32 = tpu.matmul %31, %1, %cst_19 {dimension_numbers = #tpu.dot_dimension_numbers<[1], [0], [0], [1], [0, 0, 1, 1], [], []>} : vector<8x128xbf16>, vector<128x128xbf16>, vector<8x128xf32> -> vector<8x128xf32>
    %33 = arith.addf %32, %9 : vector<8x128xf32>
    %cst_20 = arith.constant 0.000000e+00 : f32
    %34 = vector.broadcast %cst_20 : f32 to vector<8x128xf32>
    %35 = arith.maximumf %33, %34 : vector<8x128xf32>
    %36 = arith.truncf %35 : vector<8x128xf32> to vector<8x128xbf16>
    %cst_21 = arith.constant dense<0.000000e+00> : vector<8x128xf32>
    %37 = tpu.matmul %36, %2, %cst_21 {dimension_numbers = #tpu.dot_dimension_numbers<[1], [0], [0], [1], [0, 0, 1, 1], [], []>} : vector<8x128xbf16>, vector<128x128xbf16>, vector<8x128xf32> -> vector<8x128xf32>
    %38 = arith.addf %37, %12 : vector<8x128xf32>
    %39 = arith.addf %38, %30 : vector<8x128xf32>
    %cst_22 = arith.constant dense<0.000000e+00> : vector<8xf32>
    %40 = vector.multi_reduction <add>, %39, %cst_22 [1] : vector<8x128xf32> to vector<8xf32>
    %41 = vector.shape_cast %40 : vector<8xf32> to vector<8x1xf32>
    %cst_23 = arith.constant 3.125000e-02 : f32
    %42 = vector.broadcast %cst_23 : f32 to vector<8x1xf32>
    %43 = arith.mulf %41, %42 : vector<8x1xf32>
    %44 = tpu.iota {dimensions = array<i32: 1>} : vector<8x128xi32>
    %c32_i32 = arith.constant 32 : i32
    %45 = vector.broadcast %c32_i32 : i32 to vector<8x128xi32>
    %46 = arith.cmpi slt, %44, %45 : vector<8x128xi32>
    %47 = vector.broadcast %43 : vector<8x1xf32> to vector<8x128xf32>
    %48 = arith.subf %39, %47 : vector<8x128xf32>
    %cst_24 = arith.constant 0.000000e+00 : f32
    %49 = vector.broadcast %cst_24 : f32 to vector<8x128xf32>
    %50 = arith.select %46, %48, %49 : vector<8x128xi1>, vector<8x128xf32>
    %51 = arith.mulf %50, %50 : vector<8x128xf32>
    %cst_25 = arith.constant dense<0.000000e+00> : vector<8xf32>
    %52 = vector.multi_reduction <add>, %51, %cst_25 [1] : vector<8x128xf32> to vector<8xf32>
    %53 = vector.shape_cast %52 : vector<8xf32> to vector<8x1xf32>
    %cst_26 = arith.constant 3.125000e-02 : f32
    %54 = vector.broadcast %cst_26 : f32 to vector<8x1xf32>
    %55 = arith.mulf %53, %54 : vector<8x1xf32>
    %cst_27 = arith.constant 9.99999974E-6 : f32
    %56 = vector.broadcast %cst_27 : f32 to vector<8x1xf32>
    %57 = arith.addf %55, %56 : vector<8x1xf32>
    %58 = math.rsqrt %57 : vector<8x1xf32>
    %59 = vector.broadcast %58 : vector<8x1xf32> to vector<8x128xf32>
    %60 = arith.mulf %50, %59 : vector<8x128xf32>
    %c0_28 = arith.constant 0 : index
    %c0_29 = arith.constant 0 : index
    %61 = vector.load %arg8[%c0_28, %c0_29] : memref<1x128xf32, #tpu.memory_space<vmem>>, vector<1x128xf32>
    %62 = vector.broadcast %61 : vector<1x128xf32> to vector<8x128xf32>
    %63 = arith.mulf %60, %62 : vector<8x128xf32>
    %c0_30 = arith.constant 0 : index
    %c0_31 = arith.constant 0 : index
    %64 = vector.load %arg9[%c0_30, %c0_31] : memref<1x128xf32, #tpu.memory_space<vmem>>, vector<1x128xf32>
    %65 = vector.broadcast %64 : vector<1x128xf32> to vector<8x128xf32>
    %66 = arith.addf %63, %65 : vector<8x128xf32>
    %c0_32 = arith.constant 0 : index
    %c0_33 = arith.constant 0 : index
    %67 = vector.load %arg10[%c0_32, %c0_33] : memref<8x128xf32, #tpu.memory_space<vmem>>, vector<8x128xf32>
    tpu.vector_store %arg10[%c0_32, %c0_33], %66 {strides = array<i32>} : memref<8x128xf32, #tpu.memory_space<vmem>>, vector<8x128xf32>,
    return
  }
  func.func @transform_0(%arg0: i32) -> (i32, i32) {
    %c0_i32 = arith.constant 0 : i32
    %c0_i32_0 = arith.constant 0 : i32
    return %arg0, %c0_i32 : i32, i32
  }
  func.func @transform_1(%arg0: i32) -> (i32, i32) {
    %c0_i32 = arith.constant 0 : i32
    %c0_i32_0 = arith.constant 0 : i32
    return %arg0, %c0_i32 : i32, i32
  }
  func.func @transform_2(%arg0: i32) -> (i32, i32) {
    %c0_i32 = arith.constant 0 : i32
    %c0_i32_0 = arith.constant 0 : i32
    %c0_i32_1 = arith.constant 0 : i32
    return %c0_i32, %c0_i32_0 : i32, i32
  }
  func.func @transform_3(%arg0: i32) -> (i32, i32) {
    %c0_i32 = arith.constant 0 : i32
    %c0_i32_0 = arith.constant 0 : i32
    %c0_i32_1 = arith.constant 0 : i32
    return %c0_i32, %c0_i32_0 : i32, i32
  }
  func.func @transform_4(%arg0: i32) -> (i32, i32) {
    %c0_i32 = arith.constant 0 : i32
    %c0_i32_0 = arith.constant 0 : i32
    %c0_i32_1 = arith.constant 0 : i32
    return %c0_i32, %c0_i32_0 : i32, i32
  }
  func.func @transform_5(%arg0: i32) -> (i32, i32) {
    %c0_i32 = arith.constant 0 : i32
    %c0_i32_0 = arith.constant 0 : i32
    %c0_i32_1 = arith.constant 0 : i32
    return %c0_i32, %c0_i32_0 : i32, i32
  }
  func.func @transform_6(%arg0: i32) -> (i32, i32) {
    %c0_i32 = arith.constant 0 : i32
    %c0_i32_0 = arith.constant 0 : i32
    %c0_i32_1 = arith.constant 0 : i32
    return %c0_i32, %c0_i32_0 : i32, i32
  }
  func.func @transform_7(%arg0: i32) -> (i32, i32) {
    %c0_i32 = arith.constant 0 : i32
    %c0_i32_0 = arith.constant 0 : i32
    %c0_i32_1 = arith.constant 0 : i32
    return %c0_i32, %c0_i32_0 : i32, i32
  }
  func.func @transform_8(%arg0: i32) -> (i32, i32) {
    %c0_i32 = arith.constant 0 : i32
    %c0_i32_0 = arith.constant 0 : i32
    %c0_i32_1 = arith.constant 0 : i32
    return %c0_i32, %c0_i32_0 : i32, i32
  }
  func.func @transform_9(%arg0: i32) -> (i32, i32) {
    %c0_i32 = arith.constant 0 : i32
    %c0_i32_0 = arith.constant 0 : i32
    return %arg0, %c0_i32 : i32, i32
  }
}

</mosaic_0001>

<bundles_post_ra>
// kernel: tpu_custom_call.1
= control target key start
LH: loop header
LB: loop body
LE: loop exit
PB: predicated region body
PF: predicated region fallthrough
CT: control target
= control target key end

     0   :  { %s2228_s0 = inlined_call_operand.hbm [shape: f32[16,128], index: 0, kind: input, shape index: {}]   ;;  %s2229_s1 = inlined_call_operand.hbm [shape: f32[16,128], index: 1, kind: input, shape index: {}]   ;;  %s2230_s2 = inlined_call_operand.hbm [shape: bf16[128,128], index: 2, kind: input, shape index: {}]   ;;  %s2231_s3 = inlined_call_operand.hbm [shape: bf16[128,128], index: 3, kind: input, shape index: {}]   ;;  %s2232_s4 = inlined_call_operand.vmem [shape: f32[1,128], index: 4, kind: input, shape index: {}]   ;;  %s2233_s5 = inlined_call_operand.hbm [shape: bf16[128,128], index: 5, kind: input, shape index: {}]   ;;  %s2234_s6 = inlined_call_operand.vmem [shape: f32[1,128], index: 6, kind: input, shape index: {}]   ;;  %s2235_s7 = inlined_call_operand.vmem [shape: f32[1,128], index: 7, kind: input, shape index: {}]   ;;  %s2236_s8 = inlined_call_operand.vmem [shape: f32[1,128], index: 8, kind: input, shape index: {}]   ;;  %s2237_s9 = inlined_call_operand.hbm [shape: f32[16,128], index: 9, kind: output, shape index: {}]  }
   0x1   :  { %2245 = sst [smem:[#allocation19_spill]] %s2230_s2 }
   0x2   :  { %2246 = sst [smem:[#allocation20_spill]] %s2231_s3 }
   0x3   :  { %2247 = sst [smem:[#allocation21_spill]] %s2233_s5 }
   0x4   :  { %2248 = sst [smem:[#allocation22_spill]] %s2237_s9 }
   0x5   :  { %14 = vsyncpa [#allocation3], 0 }
   0x6   :  { %16 = vsyncpa [#allocation3 + $0x1], 0 }
   0x7   :  { %17 = vsyncpa [#allocation6], 0 }
   0x8   :  { %19 = vsyncpa [#allocation6 + $0x1], 0 }
   0x9   :  { %20 = vsyncpa [#allocation9], 0 }
   0xa   :  { %21 = vsyncpa [#allocation4], 0 }
   0xb   :  { %23 = vsyncpa [#allocation4 + $0x1], 0  ;;  %s1745_s30 = smov 0   ;;  %s1747_s10 = smov 0  }
   0xc   :  { %s1749_s11 = smov 0   ;;  %s1751_s12 = smov 0  }
   0xd LB: > { %2249 = sst [smem:[#allocation17_spill]] %s1671_s30  ;;  %s1766_s13 = sadd.s32 4294967295, %s1683_s12   ;;  %s1683_s12 = sphi %s1751_s12, %s2277_s12   ;;  %s1679_s11 = sphi %s1749_s11, %s2276_s11   ;;  %s1675_s10 = sphi %s1747_s10, %s2275_s10   ;;  %s1671_s30 = sphi %s1745_s30, %s2274_s30  }
   0xe   : > { %s1097_s14 = sadd.s32 4294967294, %s1683_s12   ;;  %p49_p0 = scmp.ne.s32.totalorder %s1675_s10, %s1671_s30 }
   0xf   : > { %p2238_p1 = scmp.eq.s32.totalorder %s1766_s13, 0  ;;  %p252_p3 = scmp.eq.s32.totalorder %s1097_s14, 1 }
  0x10   : > { %p1098_p5 = scmp.ge.s32.totalorder %s1683_s12, 1  ;;  %p259_p7 = scmp.lt.s32.totalorder %s1683_s12, 3 }
  0x11   : > { %p1775_p4 = por %p2238_p1, %p49_p0  ;;  %p1780_p6 = por %p252_p3, %p49_p0 }
  0x12   : > { %p1785_p8 = pnand %p1098_p5, %p259_p7  ;;  %s1685_s18 = smov [#allocation7]  }
  0x13   : > { %s2250_s15 = scalar_select %p1775_p4, 1, 0 }
  0x14   : > { %s2251_s16 = scalar_select %p1780_p6, 1, 0 }
  0x15   : > { %s2253_s17 = scalar_select %p1785_p8, 1, 0 }
  0x16   : > { %2252 = sst [smem:[#allocation18_spill]] %s2251_s16  ;;  %s271_s19 = sshll.u32 %s1685_s18, 4  ;;  %s1789_s19 = int_to_ptr.vmem [resolvable:$true] %s271_s19 }
  0x17   : > { %p1367_p9 = pneg %p1785_p8  ;;  %s1686_s21 = smov [#allocation8]  }
  0x18   : > { %s284_s22 = sshll.u32 %s1686_s21, 4  ;;  %s1687_s23 = smov [#allocation10]   ;;  %s1800_s22 = int_to_ptr.vmem [resolvable:$true] %s284_s22 }
  0x19   : > { %p1796_p11 = pnand %p1367_p9, %p2238_p1  ;;  %s1802_s24 = sshll.u32 %s1687_s23, 4  ;;  %s301_s24 = int_to_ptr.vmem [resolvable:$true] %s1802_s24 }
  0x1a   : > { %s2255_s2 = sld [smem:[#allocation19_spill]] }
  0x1b   : > { %p1812_p13 = pneg %p1796_p11 }
  0x20   : > { %s1461_s27 = scalar_lea.hbm %s2255_s2, 1024 }
  0x21   : > { %p1462_p12 = scmp.ne.s32.totalorder %s2255_s2, %s1461_s27  ;;  %p1468_p5 = scmp.lt.u32.totalorder %s1461_s27, %s2255_s2 }
  0x23   : > { %p1464_p0 = pnand %p1812_p13, %p1462_p12 }
  0x25   : > { %p1465_p3 = pneg %p1464_p0 }
  0x27   : > { %p1470_p7 = pnand %p1468_p5, %p1465_p3 }
  0x29   : > { %1473 = shalt.err (!%p1470_p7)
}
  0x2a   : > { %s1474_s23 = scalar_lea.vmem %s1789_s19, 1024  ;;  %p1482_p2 = scmp.lt.s32.totalorder %s1789_s19, %s1789_s19 }
  0x2b   : > { %p1475_p9 = scmp.ne.s32.totalorder %s1789_s19, %s1474_s23  ;;  %p1483_p6 = scmp.lt.s32.totalorder %s1474_s23, %s1474_s23 }
  0x2d   : > { %p1477_p10 = pnand %p1475_p9, %p1812_p13  ;;  %p1484_p12 = por %p1483_p6, %p1482_p2 }
  0x2f   : > { %p1478_p1 = pneg %p1477_p10 }
  0x31   : > { %p1485_p0 = pnand %p1484_p12, %p1478_p1 }
  0x33   : > { %1488 = shalt.err (!%p1485_p0)
}
  0x34   : > { %s1688_s25 = smov 64   ;;  %s1689_s26 = smov 4  }
  0x35   : > { %1370 = dma.hbm_to_vmem [thread:$0]  (!%p1796_p11), %s2255_s2, 1024, %s1789_s19, [#allocation6], %s1688_s25, %s1688_s25, %s1689_s26  }
  0x36   : > { %s2257_s3 = sld [smem:[#allocation20_spill]] }
  0x3c   : > { %s1489_s21 = scalar_lea.hbm %s2257_s3, 1024 }
  0x3d   : > { %p1490_p1 = scmp.ne.s32.totalorder %s2257_s3, %s1489_s21  ;;  %p1496_p10 = scmp.lt.u32.totalorder %s1489_s21, %s2257_s3 }
  0x3f   : > { %p1492_p2 = pnand %p1490_p1, %p1812_p13 }
  0x41   : > { %p1493_p6 = pneg %p1492_p2 }
  0x43   : > { %p1498_p3 = pnand %p1496_p10, %p1493_p6 }
  0x45   : > { %1501 = shalt.err (!%p1498_p3)
}
  0x46   : > { %s1502_s19 = scalar_lea.vmem %s1800_s22, 1024  ;;  %p1510_p12 = scmp.lt.s32.totalorder %s1800_s22, %s1800_s22 }
  0x47   : > { %p1503_p5 = scmp.ne.s32.totalorder %s1800_s22, %s1502_s19  ;;  %p1511_p0 = scmp.lt.s32.totalorder %s1502_s19, %s1502_s19 }
  0x49   : > { %p1505_p7 = pnand %p1503_p5, %p1812_p13  ;;  %p1512_p1 = por %p1511_p0, %p1510_p12 }
  0x4b   : > { %p1506_p9 = pneg %p1505_p7 }
  0x4d   : > { %p1513_p2 = pnand %p1512_p1, %p1506_p9 }
  0x4f   : > { %1516 = shalt.err (!%p1513_p2)
}
  0x50   : > { %1373 = dma.hbm_to_vmem [thread:$0]  (!%p1796_p11), %s2257_s3, 1024, %s1800_s22, [#allocation9], %s1688_s25, %s1688_s25, %s1689_s26  }
  0x51   : > { %s2258_s5 = sld [smem:[#allocation21_spill]] }
  0x57   : > { %s1517_s28 = scalar_lea.hbm %s2258_s5, 1024 }
  0x58   : > { %p1518_p6 = scmp.ne.s32.totalorder %s2258_s5, %s1517_s28  ;;  %p1524_p5 = scmp.lt.u32.totalorder %s1517_s28, %s2258_s5 }
  0x5a   : > { %p1520_p10 = pnand %p1518_p6, %p1812_p13 }
  0x5c   : > { %p1521_p3 = pneg %p1520_p10 }
  0x5e   : > { %p1526_p7 = pnand %p1524_p5, %p1521_p3 }
  0x60   : > { %1529 = shalt.err (!%p1526_p7)
}
  0x61   : > { %s1530_s19 = scalar_lea.vmem %s301_s24, 1024  ;;  %p1538_p1 = scmp.lt.s32.totalorder %s301_s24, %s301_s24 }
  0x62   : > { %p1531_p9 = scmp.ne.s32.totalorder %s301_s24, %s1530_s19  ;;  %p1539_p2 = scmp.lt.s32.totalorder %s1530_s19, %s1530_s19 }
  0x64   : > { %p1533_p12 = pnand %p1531_p9, %p1812_p13  ;;  %p1540_p4 = por %p1539_p2, %p1538_p1 }
  0x66   : > { %p1534_p0 = pneg %p1533_p12 }
  0x68   : > { %p1541_p8 = pnand %p1540_p4, %p1534_p0 }
  0x6a   : > { %1544 = shalt.err (!%p1541_p8)
}
  0x6b   : > { %1376 = dma.hbm_to_vmem [thread:$0]  (!%p1796_p11), %s2258_s5, 1024, %s301_s24, [#allocation9], %s1688_s25, %s1688_s25, %s1689_s26  }
  0x6c   : > { %s1885_s14 = sadd.s32 1, %s1683_s12   ;;  %s36_s30 = sadd.s32 1, %s1679_s11 }
  0x6d   : > { %s33_s20 = ssub.s32 %s1683_s12, %s1885_s14  ;;  %p43_p8 = scmp.ne.s32.totalorder %s1679_s11, %s1675_s10 }
  0x6e   : > { %p34_p4 = scmp.eq.s32.totalorder %s33_s20, 0  ;;  %p44_p13 = scmp.eq.s32.totalorder %s1683_s12, 0 }
  0x6f   : > { %p1391_p6 = scmp.lt.s32.totalorder %s1683_s12, 2  ;;  %p2259_p3 = scmp.eq.s32.totalorder %s1766_s13, 1 }
  0x70   : > { %s1895_s16 = scalar_select %p34_p4, %s1679_s11, %s36_s30  }
  0x71   : > { %p45_p10 = por %p44_p13, %p43_p8  ;;  %p1899_p5 = por %p2259_p3, %p43_p8 }
  0x72   : > { %s323_s28 = sand.u32 1, %s1679_s11   ;;  %s1104_s29 = sshll.u32 %s1683_s12, 7 }
  0x73   : > { %s2260_s27 = scalar_select %p1899_p5, 1, 0 }
  0x74   : > { %s1905_s24 = sshll.u32 %s323_s28, 3  ;;  %s1910_s18 = scalar_lea.hbm %s2228_s0, %s1104_s29 }
  0x75   : > { %s327_s21 = scalar_lea.vmem [#allocation2], %s1905_s24  ;;  %p1913_p11 = pnand %p1391_p6, %p45_p10 }
  0x76   : > { %s334_s23 = sshll.u32 %s327_s21, 4  ;;  %s1922_s20 = scalar_lea.hbm %s2229_s1, %s1104_s29  ;;  %s1917_s23 = int_to_ptr.vmem [resolvable:$true] %s334_s23 }
  0x77   : > { %s324_s30 = scalar_lea.sflag [#allocation3], %s323_s28  ;;  %s1545_s25 = scalar_lea.hbm %s1910_s18, 128 }
  0x78   : > { %p1546_p7 = scmp.ne.s32.totalorder %s1910_s18, %s1545_s25  ;;  %p1547_p9 = pneg %p1913_p11 }
  0x79   : > { %s1550_s2 = scalar_lea.hbm %s2228_s0, 256  ;;  %p1551_p1 = scmp.lt.u32.totalorder %s1910_s18, %s2228_s0 }
  0x7a   : > { %p1548_p12 = pnand %p1547_p9, %p1546_p7  ;;  %p1552_p2 = scmp.lt.u32.totalorder %s1550_s2, %s1545_s25 }
  0x7b   : > { %p1554_p8 = scmp.lt.u32.totalorder %s1545_s25, %s1910_s18 }
  0x7c   : > { %p1549_p0 = pneg %p1548_p12  ;;  %p1553_p4 = por %p1552_p2, %p1551_p1 }
  0x7e   : > { %p1555_p13 = por %p1554_p8, %p1553_p4 }
  0x80   : > { %p1556_p6 = pnand %p1555_p13, %p1549_p0 }
  0x82   : > { %1559 = shalt.err (!%p1556_p6)
}
  0x83   : > { %s1560_s28 = scalar_lea.vmem %s1917_s23, 128  ;;  %s1690_s29 = smov [#allocation2]  }
  0x84   : > { %p1561_p10 = scmp.ne.s32.totalorder %s1917_s23, %s1560_s28  ;;  %s1565_s22 = sshll.u32 %s1690_s29, 4  ;;  %s1566_s22 = int_to_ptr.vmem [resolvable:$false] %s1565_s22 }
  0x85   : > { %s1567_s3 = scalar_lea.vmem %s1566_s22, 256  ;;  %p1568_p12 = scmp.lt.s32.totalorder %s1917_s23, %s1566_s22 }
  0x86   : > { %p1563_p3 = pnand %p1561_p10, %p1547_p9  ;;  %p1569_p1 = scmp.lt.s32.totalorder %s1567_s3, %s1560_s28 }
  0x88   : > { %p1564_p7 = pneg %p1563_p3  ;;  %p1570_p2 = por %p1569_p1, %p1568_p12 }
  0x8a   : > { %p1571_p4 = pnand %p1570_p2, %p1564_p7 }
  0x8c   : > { %1574 = shalt.err (!%p1571_p4)
}
  0x8d   : > { %1380 = dma.hbm_to_vmem [thread:$0]  (!%p1913_p11), %s1910_s18, 128, %s1917_s23, %s324_s30  }
  0x8e   : > { %s341_s2 = sand.u32 1, %s1683_s12   ;;  %s345_s5 = scalar_lea.vmem [#allocation5], %s1905_s24 }
  0x8f   : > { %s352_s9 = sshll.u32 %s345_s5, 4  ;;  %s342_s25 = scalar_lea.sflag [#allocation6], %s341_s2  ;;  %s353_s9 = int_to_ptr.vmem [resolvable:$true] %s352_s9 }
  0x90   : > { %s1575_s26 = scalar_lea.hbm %s1922_s20, 128  ;;  %s1580_s29 = scalar_lea.hbm %s2229_s1, 256 }
  0x91   : > { %p1576_p0 = scmp.ne.s32.totalorder %s1922_s20, %s1575_s26  ;;  %p1581_p6 = scmp.lt.u32.totalorder %s1922_s20, %s2229_s1 }
  0x92   : > { %p1582_p10 = scmp.lt.u32.totalorder %s1580_s29, %s1575_s26  ;;  %p1584_p7 = scmp.lt.u32.totalorder %s1575_s26, %s1922_s20 }
  0x93   : > { %p1578_p8 = pnand %p1576_p0, %p1547_p9 }
  0x94   : > { %p1583_p3 = por %p1582_p10, %p1581_p6 }
  0x95   : > { %p1579_p13 = pneg %p1578_p8 }
  0x96   : > { %p1585_p12 = por %p1584_p7, %p1583_p3 }
  0x98   : > { %p1586_p1 = pnand %p1585_p12, %p1579_p13 }
  0x9a   : > { %1589 = shalt.err (!%p1586_p1)
}
  0x9b   : > { %s1590_s24 = scalar_lea.vmem %s353_s9, 128  ;;  %s1691_s18 = smov [#allocation5]  }
  0x9c   : > { %p1591_p2 = scmp.ne.s32.totalorder %s353_s9, %s1590_s24  ;;  %s1595_s23 = sshll.u32 %s1691_s18, 4  ;;  %s1596_s23 = int_to_ptr.vmem [resolvable:$false] %s1595_s23 }
  0x9d   : > { %s1597_s30 = scalar_lea.vmem %s1596_s23, 256  ;;  %p1598_p8 = scmp.lt.s32.totalorder %s353_s9, %s1596_s23 }
  0x9e   : > { %p1593_p4 = pnand %p1591_p2, %p1547_p9  ;;  %p1599_p5 = scmp.lt.s32.totalorder %s1597_s30, %s1590_s24 }
  0xa0   : > { %p1594_p0 = pneg %p1593_p4  ;;  %p1600_p6 = por %p1599_p5, %p1598_p8 }
  0xa2   : > { %p1601_p10 = pnand %p1600_p6, %p1594_p0 }
  0xa4   : > { %1604 = shalt.err (!%p1601_p10)
}
  0xa5   : > { %1383 = dma.hbm_to_vmem [thread:$0]  (!%p1913_p11), %s1922_s20, 128, %s353_s9, %s342_s25  }
  0xa6   : > { %p2262_p13 = scmp.ne.s32.totalorder %s2253_s17, 0 }
  0xa7   : > { %s1973_s2 = sand.u32 (!%p2262_p13), 1, %s1675_s10   ;;  %p2263_p5 = scmp.ne.s32.totalorder (!%p2262_p13), %s2250_s15, 0 }
  0xa8   : > { %361 = sbr.rel (%p2262_p13) target bundleno = 1854 (0x73e), region = 56  ;;  %s1976_s5 = sshll.u32 (!%p2262_p13), %s1973_s2, 3 }
  0xa9   : > { %s364_s26 = scalar_lea.sflag (!%p2262_p13), [#allocation3], %s1973_s2  ;;  %s367_s21 = scalar_lea.vmem (!%p2262_p13), [#allocation2], %s1976_s5 }
  0xaf   : > { %1650 = dma.done.wait (%p2263_p5), %s364_s26, 128  }
  0xb0   : > { %1652 = vsyncadd (%p2263_p5), %s364_s26, 4294967168  ;;  %s372_s17 = sand.u32 1, %s1766_s13   ;;  %s376_s20 = scalar_lea.vmem [#allocation5], %s1976_s5 }
  0xb1   : > { %s373_s19 = scalar_lea.sflag [#allocation6], %s372_s17 }
  0xb2   : > { %1654 = dma.done.wait (%p2263_p5), %s373_s19, 128  }
  0xb3   : > { %1656 = vsyncadd (%p2263_p5), %s373_s19, 4294967168  ;;  %p2264_p11 = scmp.eq.s32.totalorder %s1766_s13, 0 }
  0xb5   : > { %1658 = dma.done.wait (%p2264_p11), [#allocation6], 1024   ;;  %p2265_p9 = pmov %p2264_p11 }
  0xb7   : > { %1660 = vsyncadd (%p2265_p9), [#allocation6], 4294966272  ;;  %p2266_p3 = pmov %p2265_p9 }
  0xb9   : > { %1662 = dma.done.wait (%p2266_p3), [#allocation9], 2048   ;;  %p2267_p7 = pmov %p2266_p3 }
  0xba   : > { %v1692_v0 = vmov 0.0   ;;  %vm1693_vm0 = vmmov 0   ;;  %v1435_v1 = vld [vmem:[#allocation8] sm:$0xff]   ;;  %v1437_v3 = vld [vmem:[#allocation8 + $0x8] sm:$0xff]   ;;  %v1439_v5 = vld [vmem:[#allocation8 + $0x10] sm:$0xff]   ;;  %s1143_s18 = sshll.u32 %s1766_s13, 7 }
  0xbb   : > { %1664 = vsyncadd (%p2267_p7), [#allocation9], 4294965248  ;;  %1209 = vmatprep.subr.bf16.mxu0 %v1692_v0  ;;  %1229 = vmatprep.subr.bf16.mxu1 %v1692_v0  ;;  %v2004_v2 = vld [vmem:[#allocation7] sm:$0xff]   ;;  %v2008_v4 = vld [vmem:[#allocation7 + $0x8] sm:$0xff]   ;;  %s427_s23 = scalar_lea.vmem [#allocation11], %s1976_s5  ;;  %s2268_s17 = sld [smem:[#allocation22_spill]] }
  0xbc   : > { %1225 = vmatprep.mubr.msk.bf16.mxu0 %vm1693_vm0, %v1692_v0  ;;  %1245 = vmatprep.mubr.msk.bf16.mxu1 %vm1693_vm0, %v1692_v0  ;;  %v2013_v6 = vld [vmem:[#allocation7 + $0x10] sm:$0xff]   ;;  %v1441_v7 = vld [vmem:[#allocation8 + $0x18] sm:$0xff]   ;;  %v1443_v9 = vld [vmem:[#allocation8 + $0x20] sm:$0xff]   ;;  %s976_s30 = sshll.u32 %s427_s23, 4  ;;  %p2269_p1 = scmp.ne.s32.totalorder %s2260_s27, 0  ;;  %s2186_s30 = int_to_ptr.vmem [resolvable:$true] %s976_s30 }
  0xbd   : > { %1210 = vmatpush3.bf16.msra.mxu0 %v1435_v1  ;;  %1230 = vmatpush3.bf16.msra.mxu1 %v2004_v2  ;;  %v2018_v8 = vld [vmem:[#allocation7 + $0x18] sm:$0xff]   ;;  %v2023_v10 = vld [vmem:[#allocation7 + $0x20] sm:$0xff]   ;;  %v1445_v11 = vld [vmem:[#allocation8 + $0x28] sm:$0xff]   ;;  %s1605_s15 = scalar_lea.vmem %s2186_s30, 128  ;;  %s1694_s13 = smov [#allocation11]  }
  0xbe   : > { %1211 = vmatprep.subr.bf16.mxu0 %v1692_v0  ;;  %1231 = vmatprep.subr.bf16.mxu1 %v1692_v0  ;;  %v2028_v12 = vld [vmem:[#allocation7 + $0x28] sm:$0xff]   ;;  %v1447_v13 = vld [vmem:[#allocation8 + $0x30] sm:$0xff]   ;;  %v1449_v15 = vld [vmem:[#allocation8 + $0x38] sm:$0xff]   ;;  %p1606_p12 = scmp.ne.s32.totalorder %s2186_s30, %s1605_s15  ;;  %s1609_s5 = sshll.u32 %s1694_s13, 4  ;;  %s1610_s5 = int_to_ptr.vmem [resolvable:$false] %s1609_s5 }
  0xbf   : > { %v2031_v14 = vld [vmem:[#allocation7 + $0x30] sm:$0xff]   ;;  %v2040_v17 = vld [vmem:[#allocation7 + $0x38] sm:$0xff]   ;;  %v2044_v18 = vld [vmem:[%s367_s21] sm:$0xff]  ;;  %s1611_s9 = scalar_lea.vmem %s1610_s5, 256  ;;  %p1612_p0 = scmp.lt.s32.totalorder %s2186_s30, %s1610_s5 }
  0xc0   : > { %v462_v16 = vld [vmem:[%s376_s20] sm:$0xff]  ;;  %v582_v20 = vpack.c.bf16 %v2044_v18, %v2044_v18  ;;  %v2049_v21 = vld [vmem:[#allocation10] sm:$0xff]   ;;  %v2055_v22 = vld [vmem:[#allocation10 + $0x8] sm:$0xff]   ;;  %s963_s20 = scalar_lea.sflag [#allocation4], %s1973_s2  ;;  %p1607_p2 = pnand %p1606_p12, %p2269_p1 }
  0xc1   : > { %1212 = vmatpush3.bf16.msra.mxu0 %v1437_v3  ;;  %1232 = vmatpush3.bf16.msra.mxu1 %v2008_v4  ;;  %v463_v19 = vpack.c.bf16 %v462_v16, %v462_v16  ;;  %v2065_v23 = vld [vmem:[#allocation10 + $0x10] sm:$0xff]   ;;  %v2071_v24 = vld [vmem:[#allocation10 + $0x18] sm:$0xff]   ;;  %v2077_v25 = vld [vmem:[#allocation10 + $0x20] sm:$0xff]   ;;  %s2184_s19 = scalar_lea.hbm %s2268_s17, %s1143_s18  ;;  %p1613_p8 = scmp.lt.s32.totalorder %s1611_s9, %s1605_s15 }
  0xc2   : > { %1213 = vmatprep.subr.bf16.mxu0 %v1692_v0  ;;  %1233 = vmatprep.subr.bf16.mxu1 %v1692_v0  ;;  %v2083_v26 = vld [vmem:[#allocation10 + $0x28] sm:$0xff]   ;;  %v2096_v27 = vld [vmem:[#allocation10 + $0x30] sm:$0xff]   ;;  %v2100_v28 = vld [vmem:[#allocation10 + $0x38] sm:$0xff]   ;;  %p1608_p4 = pneg %p1607_p2 }
  0xc3   : > { %v1114_v29 = vld [vmem:[%s2232_s4] ss:$0 sm:$0xff]  ;;  %p1614_p6 = por %p1613_p8, %p1612_p0 }
  0xc4   : > { %v2131_v42 = vld [vmem:[%s2234_s6] ss:$0 sm:$0xff] }
  0xc5   : > { %1214 = vmatpush3.bf16.msra.mxu0 %v1439_v5  ;;  %1234 = vmatpush3.bf16.msra.mxu1 %v2013_v6  ;;  %p1615_p10 = pnand %p1614_p6, %p1608_p4 }
  0xc6   : > { %1215 = vmatprep.subr.bf16.mxu0 %v1692_v0  ;;  %1235 = vmatprep.subr.bf16.mxu1 %v1692_v0 }
  0xc9   : > { %1216 = vmatpush3.bf16.msra.mxu0 %v1441_v7  ;;  %1236 = vmatpush3.bf16.msra.mxu1 %v2018_v8 }
  0xca   : > { %1217 = vmatprep.subr.bf16.mxu0 %v1692_v0  ;;  %1237 = vmatprep.subr.bf16.mxu1 %v1692_v0 }
  0xcd   : > { %1218 = vmatpush3.bf16.msra.mxu0 %v1443_v9  ;;  %1238 = vmatpush3.bf16.msra.mxu1 %v2023_v10 }
  0xce   : > { %1219 = vmatprep.subr.bf16.mxu0 %v1692_v0  ;;  %1239 = vmatprep.subr.bf16.mxu1 %v1692_v0 }
  0xd1   : > { %1220 = vmatpush3.bf16.msra.mxu0 %v1445_v11  ;;  %1240 = vmatpush3.bf16.msra.mxu1 %v2028_v12 }
  0xd2   : > { %1221 = vmatprep.subr.bf16.mxu0 %v1692_v0  ;;  %1241 = vmatprep.subr.bf16.mxu1 %v1692_v0 }
  0xd5   : > { %1222 = vmatpush3.bf16.msra.mxu0 %v1447_v13  ;;  %1242 = vmatpush3.bf16.msra.mxu1 %v2031_v14  ;;  %v933_v13 = vlaneseq }
  0xd6   : > { %1223 = vmatprep.subr.bf16.mxu0 %v1692_v0  ;;  %1243 = vmatprep.subr.bf16.mxu1 %v1692_v0 }
  0xd9   : > { %1224 = vmatpush3.bf16.msra.mxu0 %v1449_v15  ;;  %1244 = vmatpush3.bf16.msra.mxu1 %v2040_v17 }
  0xda   : > { %1249 = vmatprep.subr.bf16.mxu0 %v1692_v0  ;;  %1269 = vmatprep.subr.bf16.mxu1 %v1692_v0 }
  0xdc   : > { %1226 = vmatmul.mubr.bf16.vlgmr.msra.gmra.mrb[0].mxu0 %v463_v19  ;;  %1246 = vmatmul.mubr.bf16.vlgmr.msra.gmra.mrb[0].mxu1 %v582_v20 }
  0xdd   : > { %1250 = vmatpush3.bf16.msra.mxu0 %v2049_v21  ;;  %1265 = vmatprep.mubr.msk.bf16.mxu0 %vm1693_vm0, %v1692_v0 }
  0xde   : > { %1251 = vmatprep.subr.bf16.mxu0 %v1692_v0  ;;  %1270 = vmatpush3.bf16.msra.mxu1 %v2004_v2 }
  0xdf   : > { %1285 = vmatprep.mubr.msk.bf16.mxu1 %vm1693_vm0, %v1692_v0  ;;  %1271 = vmatprep.subr.bf16.mxu1 %v1692_v0 }
  0xe1   : > { %1252 = vmatpush3.bf16.msra.mxu0 %v2055_v22 }
  0xe2   : > { %1253 = vmatprep.subr.bf16.mxu0 %v1692_v0  ;;  %1272 = vmatpush3.bf16.msra.mxu1 %v2008_v4 }
  0xe3   : > { %1273 = vmatprep.subr.bf16.mxu1 %v1692_v0 }
  0xe5   : > { %1254 = vmatpush3.bf16.msra.mxu0 %v2065_v23 }
  0xe6   : > { %1255 = vmatprep.subr.bf16.mxu0 %v1692_v0  ;;  %1274 = vmatpush3.bf16.msra.mxu1 %v2013_v6 }
  0xe7   : > { %1275 = vmatprep.subr.bf16.mxu1 %v1692_v0 }
  0xe9   : > { %1256 = vmatpush3.bf16.msra.mxu0 %v2071_v24 }
  0xea   : > { %1257 = vmatprep.subr.bf16.mxu0 %v1692_v0  ;;  %1276 = vmatpush3.bf16.msra.mxu1 %v2018_v8 }
  0xeb   : > { %1277 = vmatprep.subr.bf16.mxu1 %v1692_v0 }
  0xed   : > { %1258 = vmatpush3.bf16.msra.mxu0 %v2077_v25 }
  0xee   : > { %1259 = vmatprep.subr.bf16.mxu0 %v1692_v0  ;;  %1278 = vmatpush3.bf16.msra.mxu1 %v2023_v10 }
  0xef   : > { %1279 = vmatprep.subr.bf16.mxu1 %v1692_v0 }
  0xf1   : > { %1260 = vmatpush3.bf16.msra.mxu0 %v2083_v26 }
  0xf2   : > { %1261 = vmatprep.subr.bf16.mxu0 %v1692_v0  ;;  %1280 = vmatpush3.bf16.msra.mxu1 %v2028_v12 }
  0xf3   : > { %1281 = vmatprep.subr.bf16.mxu1 %v1692_v0 }
  0xf5   : > { %1262 = vmatpush3.bf16.msra.mxu0 %v2096_v27 }
  0xf6   : > { %1282 = vmatpush3.bf16.msra.mxu1 %v2031_v14  ;;  %1263 = vmatprep.subr.bf16.mxu0 %v1692_v0 }
  0xf7   : > { %1283 = vmatprep.subr.bf16.mxu1 %v1692_v0 }
  0xf9   : > { %1264 = vmatpush3.bf16.msra.mxu0 %v2100_v28 }
  0xfa   : > { %1284 = vmatpush3.bf16.msra.mxu1 %v2040_v17  ;;  %1289 = vmatprep.subr.bf16.mxu0 %v1692_v0 }
  0xfb   : > { %1309 = vmatprep.subr.bf16.mxu1 %v1692_v0 }
 0x1af   : > { %v569_v30 = vpop.f32.mrb[0].mxu0  ;;  %v665_v32 = vpop.f32.mrb[0].mxu1 }
 0x1b0   : > { %v2107_v31 = vadd.f32 %v1114_v29, %v569_v30  ;;  %v1227_v33 = vpop.f32.mrb[1].mxu0  ;;  %v1247_v34 = vpop.f32.mrb[1].mxu1 }
 0x1b1   : > { %v572_v35 = vpop.f32.mrb[2].mxu0  ;;  %v668_v37 = vpop.f32.mrb[2].mxu1 }
 0x1b2   : > { %v666_v36 = vadd.f32 %v665_v32, %v2107_v31  ;;  %v1228_v38 = vpop.f32.mrb[3].mxu0  ;;  %v1248_v39 = vpop.f32.mrb[3].mxu1 }
 0x1b4   : > { %v671_v40 = vmax.f32 %v666_v36, 0.0 }
 0x1b6   : > { %v672_v41 = vpack.c.bf16 %v671_v40, %v671_v40 }
 0x1b8   : > { %1266 = vmatmul.mubr.bf16.vlgmr.msra.gmra.mrb[4].mxu0 %v672_v41 }
 0x1b9   : > { %1290 = vmatpush3.bf16.msra.mxu0 %v2049_v21  ;;  %1305 = vmatprep.mubr.msk.bf16.mxu0 %vm1693_vm0, %v1692_v0 }
 0x1ba   : > { %1291 = vmatprep.subr.bf16.mxu0 %v1692_v0 }
 0x1bd   : > { %1292 = vmatpush3.bf16.msra.mxu0 %v2055_v22 }
 0x1be   : > { %1293 = vmatprep.subr.bf16.mxu0 %v1692_v0 }
 0x1c1   : > { %1294 = vmatpush3.bf16.msra.mxu0 %v2065_v23 }
 0x1c2   : > { %1295 = vmatprep.subr.bf16.mxu0 %v1692_v0 }
 0x1c5   : > { %1296 = vmatpush3.bf16.msra.mxu0 %v2071_v24 }
 0x1c6   : > { %1297 = vmatprep.subr.bf16.mxu0 %v1692_v0 }
 0x1c9   : > { %1298 = vmatpush3.bf16.msra.mxu0 %v2077_v25 }
 0x1ca   : > { %1299 = vmatprep.subr.bf16.mxu0 %v1692_v0 }
 0x1cd   : > { %1300 = vmatpush3.bf16.msra.mxu0 %v2083_v26 }
 0x1ce   : > { %1301 = vmatprep.subr.bf16.mxu0 %v1692_v0 }
 0x1d1   : > { %1302 = vmatpush3.bf16.msra.mxu0 %v2096_v27 }
 0x1d2   : > { %1303 = vmatprep.subr.bf16.mxu0 %v1692_v0 }
 0x1d5   : > { %1304 = vmatpush3.bf16.msra.mxu0 %v2100_v28 }
 0x1d6   : > { %1329 = vmatprep.subr.bf16.mxu0 %v1692_v0 }
 0x28b   : > { %v755_v43 = vpop.f32.mrb[4].mxu0 }
 0x28c   : > { %v756_v44 = vadd.f32 %v2131_v42, %v755_v43  ;;  %v1267_v45 = vpop.f32.mrb[5].mxu0 }
 0x28d   : > { %v758_v46 = vpop.f32.mrb[6].mxu0 }
 0x28e   : > { %v761_v47 = vadd.f32 %v756_v44, %v2044_v18  ;;  %v1268_v48 = vpop.f32.mrb[7].mxu0 }
 0x290   : > { %v762_v49 = vpack.c.bf16 %v761_v47, %v761_v47 }
 0x292   : > { %1286 = vmatmul.mubr.bf16.vlgmr.msra.gmra.mrb[4].mxu1 %v762_v49 }
 0x293   : > { %1310 = vmatpush3.bf16.msra.mxu1 %v2004_v2  ;;  %1325 = vmatprep.mubr.msk.bf16.mxu1 %vm1693_vm0, %v1692_v0 }
 0x294   : > { %1311 = vmatprep.subr.bf16.mxu1 %v1692_v0 }
 0x297   : > { %1312 = vmatpush3.bf16.msra.mxu1 %v2008_v4 }
 0x298   : > { %1313 = vmatprep.subr.bf16.mxu1 %v1692_v0 }
 0x29b   : > { %1314 = vmatpush3.bf16.msra.mxu1 %v2013_v6 }
 0x29c   : > { %1315 = vmatprep.subr.bf16.mxu1 %v1692_v0 }
 0x29f   : > { %1316 = vmatpush3.bf16.msra.mxu1 %v2018_v8 }
 0x2a0   : > { %1317 = vmatprep.subr.bf16.mxu1 %v1692_v0 }
 0x2a3   : > { %1318 = vmatpush3.bf16.msra.mxu1 %v2023_v10 }
 0x2a4   : > { %1319 = vmatprep.subr.bf16.mxu1 %v1692_v0 }
 0x2a7   : > { %1320 = vmatpush3.bf16.msra.mxu1 %v2028_v12 }
 0x2a8   : > { %1321 = vmatprep.subr.bf16.mxu1 %v1692_v0 }
 0x2ab   : > { %1322 = vmatpush3.bf16.msra.mxu1 %v2031_v14  ;;  %v934_v14 = vand.u32 127, %v933_v13 }
 0x2ac   : > { %1323 = vmatprep.subr.bf16.mxu1 %v1692_v0 }
 0x2ad   : > { %vm935_vm1 = vcmp.lt.s32.totalorder %v934_v14, 32 }
 0x2af   : > { %1324 = vmatpush3.bf16.msra.mxu1 %v2040_v17 }
 0x365   : > { %v797_v50 = vpop.f32.mrb[4].mxu1 }
 0x366   : > { %v798_v51 = vadd.f32 %v797_v50, %v2107_v31  ;;  %v1287_v52 = vpop.f32.mrb[5].mxu1 }
 0x367   : > { %v800_v53 = vpop.f32.mrb[6].mxu1 }
 0x368   : > { %v803_v54 = vmax.f32 %v798_v51, 0.0  ;;  %v1288_v55 = vpop.f32.mrb[7].mxu1 }
 0x36a   : > { %v804_v56 = vpack.c.bf16 %v803_v54, %v803_v54 }
 0x36c   : > { %1306 = vmatmul.mubr.bf16.vlgmr.msra.gmra.mrb[8].mxu0 %v804_v56 }
 0x36d   : > { %1330 = vmatpush3.bf16.msra.mxu0 %v2049_v21  ;;  %1345 = vmatprep.mubr.msk.bf16.mxu0 %vm1693_vm0, %v1692_v0 }
 0x36e   : > { %1331 = vmatprep.subr.bf16.mxu0 %v1692_v0 }
 0x371   : > { %1332 = vmatpush3.bf16.msra.mxu0 %v2055_v22 }
 0x372   : > { %1333 = vmatprep.subr.bf16.mxu0 %v1692_v0 }
 0x375   : > { %1334 = vmatpush3.bf16.msra.mxu0 %v2065_v23 }
 0x376   : > { %1335 = vmatprep.subr.bf16.mxu0 %v1692_v0 }
 0x379   : > { %1336 = vmatpush3.bf16.msra.mxu0 %v2071_v24  ;;  %v1140_v24 = vld [vmem:[%s2235_s7] ss:$0 sm:$0xff] }
 0x37a   : > { %1337 = vmatprep.subr.bf16.mxu0 %v1692_v0 }
 0x37d   : > { %1338 = vmatpush3.bf16.msra.mxu0 %v2077_v25 }
 0x37e   : > { %1339 = vmatprep.subr.bf16.mxu0 %v1692_v0 }
 0x381   : > { %1340 = vmatpush3.bf16.msra.mxu0 %v2083_v26  ;;  %v1141_v26 = vld [vmem:[%s2236_s8] ss:$0 sm:$0xff] }
 0x382   : > { %1341 = vmatprep.subr.bf16.mxu0 %v1692_v0 }
 0x385   : > { %1342 = vmatpush3.bf16.msra.mxu0 %v2096_v27 }
 0x386   : > { %1343 = vmatprep.subr.bf16.mxu0 %v1692_v0 }
 0x389   : > { %1344 = vmatpush3.bf16.msra.mxu0 %v2100_v28 }
 0x43f   : > { %v839_v57 = vpop.f32.mrb[8].mxu0 }
 0x440   : > { %v840_v58 = vadd.f32 %v2131_v42, %v839_v57  ;;  %v1307_v59 = vpop.f32.mrb[9].mxu0 }
 0x441   : > { %v842_v60 = vpop.f32.mrb[10].mxu0 }
 0x442   : > { %v845_v61 = vadd.f32 %v840_v58, %v761_v47  ;;  %v1308_v62 = vpop.f32.mrb[11].mxu0 }
 0x444   : > { %v846_v63 = vpack.c.bf16 %v845_v61, %v845_v61 }
 0x446   : > { %1326 = vmatmul.mubr.bf16.vlgmr.msra.gmra.mrb[8].mxu1 %v846_v63 }
 0x519   : > { %v881_v1 = vpop.f32.mrb[8].mxu1 }
 0x51a   : > { %v882_v2 = vadd.f32 %v881_v1, %v2107_v31  ;;  %v1327_v3 = vpop.f32.mrb[9].mxu1 }
 0x51b   : > { %v884_v4 = vpop.f32.mrb[10].mxu1 }
 0x51c   : > { %v887_v5 = vmax.f32 %v882_v2, 0.0  ;;  %v1328_v6 = vpop.f32.mrb[11].mxu1 }
 0x51e   : > { %v888_v7 = vpack.c.bf16 %v887_v5, %v887_v5 }
 0x520   : > { %1346 = vmatmul.mubr.bf16.vlgmr.msra.gmra.mrb[12].mxu0 %v888_v7 }
 0x5f3   : > { %v923_v0 = vpop.f32.mrb[12].mxu0 }
 0x5f4   : > { %v924_v8 = vadd.f32 %v2131_v42, %v923_v0  ;;  %v1347_v9 = vpop.f32.mrb[13].mxu0 }
 0x5f5   : > { %v926_v10 = vpop.f32.mrb[14].mxu0 }
 0x5f6   : > { %v1348_v11 = vpop.f32.mrb[15].mxu0  ;;  %v929_v12 = vadd.f32 %v924_v8, %v845_v61 }
 0x5f8   : > { %930 = vadd.xlane.f32.xlu0 %v929_v12 }
 0x685   : > { %v931_v15 = vpop.xlane.xlu0 %930 }
 0x686   : > { %v932_v16 = vmul.f32 0.03125, %v931_v15 }
 0x688   : > { %v936_v17 = vsub.f32 %v929_v12, %v932_v16 }
 0x68a   : > { %v937_v18 = vsel %vm935_vm1, %v936_v17, 0.0 }
 0x68b   : > { %v938_v19 = vmul.f32 %v937_v18, %v937_v18 }
 0x68d   : > { %939 = vadd.xlane.f32.xlu0 %v938_v19 }
 0x71a   : > { %v940_v20 = vpop.xlane.xlu0 %939 }
 0x71b   : > { %v941_v21 = vmul.f32 0.03125, %v940_v20 }
 0x71d   : > { %v942_v22 = vadd.f32 1e-05, %v941_v21 }
 0x71f   : > { %1459 = vrsqrt.f32 %v942_v22 }
 0x729   : > { %v1460_v23 = vpop.eup %1459 }
 0x72a   : > { %v944_v25 = vmul.f32 %v1460_v23, %v937_v18 }
 0x72c   : > { %v952_v27 = vmul.f32 %v1140_v24, %v944_v25 }
 0x72e   : > { %v960_v28 = vadd.f32 %v1141_v26, %v952_v27 }
 0x730   : > { %961 = vst [vmem:[%s427_s23] sm:$0xff] %v960_v28 }
 0x731   : > { %1618 = shalt.err (!%p1615_p10)
}
 0x732   : > { %s1619_s2 = scalar_lea.hbm %s2184_s19, 128  ;;  %s1623_s29 = scalar_lea.hbm %s2268_s17, 256 }
 0x733   : > { %p1620_p13 = scmp.ne.s32.totalorder %s2184_s19, %s1619_s2  ;;  %p1624_p9 = scmp.lt.u32.totalorder %s2184_s19, %s2268_s17 }
 0x734   : > { %p1625_p3 = scmp.lt.u32.totalorder %s1623_s29, %s1619_s2  ;;  %p1627_p12 = scmp.lt.u32.totalorder %s1619_s2, %s2184_s19 }
 0x735   : > { %p1621_p5 = pnand %p1620_p13, %p2269_p1 }
 0x736   : > { %p1626_p7 = por %p1625_p3, %p1624_p9 }
 0x737   : > { %p1622_p11 = pneg %p1621_p5 }
 0x738   : > { %p1628_p2 = por %p1627_p12, %p1626_p7 }
 0x73a   : > { %p1629_p4 = pnand %p1628_p2, %p1622_p11 }
 0x73c   : > { %1632 = shalt.err (!%p1629_p4)
}
 0x73d   : > { %1365 = dma.vmem_to_hbm [thread:$0]  (%p2269_p1), %s2186_s30, 128, %s2184_s19, %s963_s20  }
 0x73e PF: > { %s2270_s24 = sld [smem:[#allocation17_spill]]  ;;  %s2271_s18 = sld [smem:[#allocation18_spill]] }
 0x73f   : > { %p2273_p8 = scmp.ge.s32.totalorder %s1683_s12, 2 }
 0x744   : > { %s988_s23 = sand.u32 1, %s2270_s24   ;;  %p2272_p0 = scmp.ne.s32.totalorder %s2271_s18, 0 }
 0x745   : > { %s989_s26 = scalar_lea.sflag [#allocation4], %s988_s23 }
 0x746   : > { %p1385_p6 = pnand %p2273_p8, %p2272_p0 }
 0x748   : > { %1666 = dma.done.wait (!%p1385_p6), %s989_s26, 128  }
 0x749   : > { %1668 = vsyncadd (!%p1385_p6), %s989_s26, 4294967168  ;;  %p26_p10 = scmp.ge.s32.totalorder %s1885_s14, 4   ;;  %s2274_s30 = smov %s1675_s10 }
 0x74a   : > { %s2275_s10 = smov %s1679_s11  ;;  %s2276_s11 = smov %s1895_s16 }
 0x74b   : > { %s2277_s12 = smov %s1885_s14  ;;  %28 = sbr.rel (!%p26_p10) target bundleno = 13 (0xd), region = 126 }
 0x752   :  { %994 = vsyncpa [#allocation3], 1 }
 0x753   :  { %996 = vsyncpa [#allocation3 + $0x1], 1 }
 0x754   :  { %997 = vsyncpa [#allocation6], 1 }
 0x755   :  { %999 = vsyncpa [#allocation6 + $0x1], 1 }
 0x756   :  { %1000 = vsyncpa [#allocation9], 1 }
 0x757   :  { %1001 = vsyncpa [#allocation4], 1 }
 0x758   :  { %1003 = vsyncpa [#allocation4 + $0x1], 1 }

</bundles_post_ra>
